<compile_context>
chip_gen: v7x
topology: tpu7x:2x2x1
jax: 0.10.0
libtpu: 0.0.40
codegen_flags: <defaults>
</compile_context>

<pallas_src>
import functools

import jax
import jax.numpy as jnp
from jax.experimental import pallas as pl
from jax.experimental.pallas import tpu as pltpu


def _ce_label_smooth_kernel(x_ref, lbl_ref, loss_ref, *, epsilon, num_classes):
    """Per-row label-smoothed CE for one (TB, C) tile of logits.

    x_ref   : (TB, C) logits (any float dtype, upcast to f32 here)
    lbl_ref : (TB, 1) int32 class indices
    loss_ref: (TB, 1) f32 per-row loss
    """
    x = x_ref[...].astype(jnp.float32)                       # (TB, C)
    labels = lbl_ref[...]                                    # (TB, 1)

    # Numerically stable logsumexp pieces (the only full-(TB,C) passes).
    m = jnp.max(x, axis=-1, keepdims=True)                   # (TB, 1)
    lse = jnp.log(jnp.sum(jnp.exp(x - m), axis=-1, keepdims=True))
    row_sum = jnp.sum(x, axis=-1, keepdims=True)             # (TB, 1)

    # x[label] without materializing a one-hot: masked row reduction.
    cls_ids = jax.lax.broadcasted_iota(jnp.int32, x.shape, dimension=1)
    x_at_label = jnp.sum(jnp.where(cls_ids == labels, x, 0.0),
                         axis=-1, keepdims=True)             # (TB, 1)

    # -sum_c smoothed_c * log_probs_c
    #   = (m + lse) - (1 - eps) * x[label] - (eps / C) * sum_c x_c
    mlse = m + lse
    loss_ref[...] = (mlse
                     - (1.0 - epsilon) * x_at_label
                     - (epsilon / num_classes) * row_sum)


def _pick_block_b(batch, num_classes, itemsize,
                  target_block_bytes=4 * 1024 * 1024):
    """Largest row tile with ~target_block_bytes of logits (multiple of 8)."""
    rows = max(8, target_block_bytes // max(num_classes * itemsize, 1))
    if batch <= rows:
        return batch                       # single grid step, whole batch
    return max(8, (min(int(rows), 2048) // 8) * 8)


def cross_entropy_label_smooth(inputs, targets, *, num_classes, epsilon=0.1,
                               block_b=None):
    """JAX/Pallas equivalent of CrossEntropyLabelSmooth.forward.

    inputs:  (B, C) float array (logits, any float dtype)
    targets: (B,)   integer class indices
    returns: scalar float32 loss
    """
    B, C = inputs.shape
    assert C == num_classes

    if block_b is None:
        block_b = _pick_block_b(B, C, jnp.dtype(inputs.dtype).itemsize)
    block_b = min(block_b, B)

    labels_2d = targets.astype(jnp.int32).reshape(B, 1)
    grid_b = pl.cdiv(B, block_b)

    kernel = functools.partial(
        _ce_label_smooth_kernel,
        epsilon=float(epsilon),
        num_classes=int(num_classes),
    )

    per_row = pl.pallas_call(
        kernel,
        out_shape=jax.ShapeDtypeStruct((B, 1), jnp.float32),
        grid_spec=pltpu.PrefetchScalarGridSpec(
            num_scalar_prefetch=0,
            grid=(grid_b,),
            in_specs=[
                # Logits streamed in native dtype, one large row tile per step.
                pl.BlockSpec((block_b, C), lambda i: (i, 0)),
                # Labels: tiny per-block slice (B*4 bytes total).
                pl.BlockSpec((block_b, 1), lambda i: (i, 0)),
            ],
            # Per-row loss output: every grid step writes its own slice, so the
            # batch axis can be sharded across TensorCores.
            out_specs=pl.BlockSpec((block_b, 1), lambda i: (i, 0)),
        ),
        compiler_params=pltpu.CompilerParams(
            dimension_semantics=("parallel",),
            vmem_limit_bytes=32 * 1024 * 1024,
        ),
    )(inputs, labels_2d)

    # (-smoothed * log_probs).mean(0).sum() == sum(per_row) / B
    return jnp.sum(per_row) / B


def _reference(inputs, targets, num_classes, epsilon=0.1):
    """Pure-JAX reference mirroring the PyTorch forward."""
    log_probs = jax.nn.log_softmax(inputs.astype(jnp.float32), axis=1)
    one_hot = jax.nn.one_hot(targets, num_classes, dtype=jnp.float32)
    smoothed = (1.0 - epsilon) * one_hot + epsilon / num_classes
    return jnp.sum(jnp.mean(-smoothed * log_probs, axis=0))


if __name__ == "__main__":
    EPSILON = 0.1
    key = jax.random.PRNGKey(0)

    # Case 1: small demo shape, single grid step.
    B1, C1 = 16, 32
    k_x, k_t, k_x2, k_t2 = jax.random.split(key, 4)
    x1 = jax.random.normal(k_x, (B1, C1), dtype=jnp.float32)
    t1 = jax.random.randint(k_t, (B1,), 0, C1, dtype=jnp.int32)
    loss1 = jax.block_until_ready(
        cross_entropy_label_smooth(x1, t1, num_classes=C1, epsilon=EPSILON))
    ref1 = _reference(x1, t1, C1, EPSILON)
    assert jnp.allclose(loss1, ref1, rtol=1e-5, atol=1e-5), (loss1, ref1)

    # Case 2: forced small block to exercise the multi-block parallel grid.
    B2, C2 = 64, 40
    x2 = jax.random.normal(k_x2, (B2, C2), dtype=jnp.float32)
    t2 = jax.random.randint(k_t2, (B2,), 0, C2, dtype=jnp.int32)
    loss2 = jax.block_until_ready(
        cross_entropy_label_smooth(x2, t2, num_classes=C2, epsilon=EPSILON,
                                   block_b=16))
    ref2 = _reference(x2, t2, C2, EPSILON)
    assert jnp.allclose(loss2, ref2, rtol=1e-5, atol=1e-5), (loss2, ref2)

    print("KERNEL_OK")
</pallas_src>

<mosaic_0001>
module attributes {stable_mosaic.version = 11 : i64} {
  func.func @_ce_label_smooth_kernel(%arg0: i32, %arg1: memref<16x32xf32, #tpu.memory_space<vmem>>, %arg2: memref<16x1xi32, #tpu.memory_space<vmem>>, %arg3: memref<16x1xf32, #tpu.memory_space<vmem>>) attributes {dimension_semantics = [#tpu.dimension_semantics<parallel>], iteration_bounds = array<i64: 1>, scalar_prefetch = 0 : i64, scratch_operands = 0 : i64, tpu.core_type = #tpu.core_type<tc>, window_params = [{transform_indices = @transform_0, window_bounds = array<i64: 16, 32>}, {transform_indices = @transform_1, window_bounds = array<i64: 16, 1>}, {transform_indices = @transform_2, window_bounds = array<i64: 16, 1>}]} {
    %c0 = arith.constant 0 : index
    %c0_0 = arith.constant 0 : index
    %0 = vector.load %arg1[%c0, %c0_0] : memref<16x32xf32, #tpu.memory_space<vmem>>, vector<16x32xf32>
    %c0_1 = arith.constant 0 : index
    %c0_2 = arith.constant 0 : index
    %1 = vector.load %arg2[%c0_1, %c0_2] : memref<16x1xi32, #tpu.memory_space<vmem>>, vector<16x1xi32>
    %cst = arith.constant dense<0xFF800000> : vector<16xf32>
    %2 = vector.multi_reduction <maximumf>, %0, %cst [1] : vector<16x32xf32> to vector<16xf32>
    %3 = vector.shape_cast %2 : vector<16xf32> to vector<16x1xf32>
    %4 = vector.broadcast %3 : vector<16x1xf32> to vector<16x32xf32>
    %5 = arith.subf %0, %4 : vector<16x32xf32>
    %6 = math.exp %5 : vector<16x32xf32>
    %cst_3 = arith.constant dense<0.000000e+00> : vector<16xf32>
    %7 = vector.multi_reduction <add>, %6, %cst_3 [1] : vector<16x32xf32> to vector<16xf32>
    %8 = vector.shape_cast %7 : vector<16xf32> to vector<16x1xf32>
    %9 = math.log %8 : vector<16x1xf32>
    %cst_4 = arith.constant dense<0.000000e+00> : vector<16xf32>
    %10 = vector.multi_reduction <add>, %0, %cst_4 [1] : vector<16x32xf32> to vector<16xf32>
    %11 = vector.shape_cast %10 : vector<16xf32> to vector<16x1xf32>
    %12 = tpu.iota {dimensions = array<i32: 1>} : vector<16x32xi32>
    %13 = vector.broadcast %1 : vector<16x1xi32> to vector<16x32xi32>
    %14 = arith.cmpi eq, %12, %13 : vector<16x32xi32>
    %cst_5 = arith.constant 0.000000e+00 : f32
    %15 = vector.broadcast %cst_5 : f32 to vector<16x32xf32>
    %16 = arith.select %14, %0, %15 : vector<16x32xi1>, vector<16x32xf32>
    %cst_6 = arith.constant dense<0.000000e+00> : vector<16xf32>
    %17 = vector.multi_reduction <add>, %16, %cst_6 [1] : vector<16x32xf32> to vector<16xf32>
    %18 = vector.shape_cast %17 : vector<16xf32> to vector<16x1xf32>
    %19 = arith.addf %3, %9 : vector<16x1xf32>
    %cst_7 = arith.constant 0.899999976 : f32
    %20 = vector.broadcast %cst_7 : f32 to vector<16x1xf32>
    %21 = arith.mulf %20, %18 : vector<16x1xf32>
    %22 = arith.subf %19, %21 : vector<16x1xf32>
    %cst_8 = arith.constant 3.125000e-03 : f32
    %23 = vector.broadcast %cst_8 : f32 to vector<16x1xf32>
    %24 = arith.mulf %23, %11 : vector<16x1xf32>
    %25 = arith.subf %22, %24 : vector<16x1xf32>
    %c0_9 = arith.constant 0 : index
    %c0_10 = arith.constant 0 : index
    %26 = vector.load %arg3[%c0_9, %c0_10] : memref<16x1xf32, #tpu.memory_space<vmem>>, vector<16x1xf32>
    tpu.vector_store %arg3[%c0_9, %c0_10], %25 {strides = array<i32>} : memref<16x1xf32, #tpu.memory_space<vmem>>, vector<16x1xf32>,
    return
  }
  func.func @transform_0(%arg0: i32) -> (i32, i32) {
    %c0_i32 = arith.constant 0 : i32
    %c0_i32_0 = arith.constant 0 : i32
    return %arg0, %c0_i32 : i32, i32
  }
  func.func @transform_1(%arg0: i32) -> (i32, i32) {
    %c0_i32 = arith.constant 0 : i32
    %c0_i32_0 = arith.constant 0 : i32
    return %arg0, %c0_i32 : i32, i32
  }
  func.func @transform_2(%arg0: i32) -> (i32, i32) {
    %c0_i32 = arith.constant 0 : i32
    %c0_i32_0 = arith.constant 0 : i32
    return %arg0, %c0_i32 : i32, i32
  }
}

</mosaic_0001>

<bundles_post_ra>
// kernel: tpu_custom_call.1
= control target key start
LH: loop header
LB: loop body
LE: loop exit
PB: predicated region body
PF: predicated region fallthrough
CT: control target
= control target key end

     0   :  { %vm15_vm0 = vcmask 261120   ;;  %v90_v2 = vmov 0   ;;  %v44_v11 = vlaneseq  ;;  %vm72_vm3 = vcmask 7168   ;;  %s132_s0 = inlined_call_operand.vmem [shape: f32[16,32], index: 0, kind: input, shape index: {}]   ;;  %s133_s1 = inlined_call_operand.vmem [shape: s32[16,1], index: 1, kind: input, shape index: {}]   ;;  %s134_s2 = inlined_call_operand.vmem [shape: f32[16,1], index: 2, kind: output, shape index: {}]  }
   0x1   :  { %v11_v0 = vld [vmem:[%s132_s0] sm:$0xff]  ;;  %v12_v1 = vld [vmem:[%s132_s0 + $0x8] sm:$0xff]  ;;  %80 = vset.pattern.permute.xlu1 %v90_v2  ;;  %81 = vset.pattern.permute.xlu0 %v90_v2 }
   0x2   :  { %v13_v3 = vld [vmem:[%s133_s1] sm:$0xff]  ;;  %v16_v4 = vsel %vm15_vm0, %v11_v0, -inf  ;;  %v14_v5 = vld [vmem:[%s133_s1 + $0x8] sm:$0xff]  ;;  %v19_v6 = vsel %vm15_vm0, %v12_v1, -inf  ;;  %v45_v15 = vand.u32 127, %v44_v11  ;;  %v38_v25 = vsel %vm15_vm0, %v11_v0, 0.0 }
   0x3   :  { %47 = vperm.xlu1 %80, %v13_v3   ;;  %17 = vmax.xlane.f32.xlu0 %v16_v4  ;;  %v41_v26 = vsel %vm15_vm0, %v12_v1, 0.0 }
   0x7   :  { %50 = vperm.xlu1 %80, %v14_v5   ;;  %20 = vmax.xlane.f32.xlu0 %v19_v6 }
  0x82   :  { %v48_v14 = vpop.permute.xlu1 %47 }
  0x83   :  { %vm52_vm1 = vcmp.eq.s32.totalorder %v45_v15, %v48_v14 }
  0x84   :  { %v54_v18 = vsel %vm52_vm1, %v11_v0, 0.0 }
  0x85   :  { %v56_v20 = vsel %vm15_vm0, %v54_v18, 0.0 }
  0x86   :  { %v51_v16 = vpop.permute.xlu1 %50 }
  0x87   :  { %vm53_vm2 = vcmp.eq.s32.totalorder %v45_v15, %v51_v16 }
  0x88   :  { %v55_v22 = vsel %vm53_vm2, %v12_v1, 0.0 }
  0x89   :  { %v59_v24 = vsel %vm15_vm0, %v55_v22, 0.0 }
  0x90   :  { %v18_v7 = vpop.xlane.xlu0 %17 }
  0x91   :  { %v22_v8 = vsub.f32 %v11_v0, %v18_v7 }
  0x93   :  { %v24_v9 = vmul.f32 1.442695, %v22_v8 }
  0x94   :  { %v21_v10 = vpop.xlane.xlu0 %20 }
  0x95   :  { %82 = vpow2.f32 %v24_v9  ;;  %v23_v12 = vsub.f32 %v12_v1, %v21_v10 }
  0x97   :  { %v26_v13 = vmul.f32 1.442695, %v23_v12 }
  0x99   :  { %84 = vpow2.f32 %v26_v13 }
  0x9f   :  { %v83_v17 = vpop.eup %82 }
  0xa0   :  { %v28_v19 = vsel %vm15_vm0, %v83_v17, 0.0 }
  0xa1   :  { %29 = vadd.xlane.f32.xlu0 %v28_v19 }
  0xa3   :  { %v85_v21 = vpop.eup %84 }
  0xa4   :  { %v31_v23 = vsel %vm15_vm0, %v85_v21, 0.0 }
  0xa5   :  { %57 = vadd.xlane.f32.xlu0 %v56_v20  ;;  %32 = vadd.xlane.f32.xlu1 %v31_v23 }
  0xa9   :  { %60 = vadd.xlane.f32.xlu0 %v59_v24 }
  0xad   :  { %39 = vadd.xlane.f32.xlu0 %v38_v25 }
  0xb1   :  { %42 = vadd.xlane.f32.xlu0 %v41_v26 }
 0x12e   :  { %v30_v27 = vpop.xlane.xlu0 %29 }
 0x12f   :  { %86 = vlog2.f32 %v30_v27 }
 0x132   :  { %v33_v28 = vpop.xlane.xlu1 %32  ;;  %v58_v29 = vpop.xlane.xlu0 %57 }
 0x133   :  { %88 = vlog2.f32 %v33_v28  ;;  %v64_v35 = vmul.f32 0.9, %v58_v29 }
 0x136   :  { %v61_v30 = vpop.xlane.xlu0 %60 }
 0x137   :  { %v65_v42 = vmul.f32 0.9, %v61_v30 }
 0x139   :  { %v87_v31 = vpop.eup %86 }
 0x13a   :  { %v35_v32 = vmul.f32 0.6931472, %v87_v31  ;;  %v40_v33 = vpop.xlane.xlu0 %39 }
 0x13b   :  { %v68_v36 = vmul.f32 0.003125, %v40_v33 }
 0x13c   :  { %v62_v34 = vadd.f32 %v35_v32, %v18_v7 }
 0x13d   :  { %v89_v37 = vpop.eup %88 }
 0x13e   :  { %v37_v38 = vmul.f32 0.6931472, %v89_v37  ;;  %v66_v39 = vsub.f32 %v62_v34, %v64_v35  ;;  %v43_v40 = vpop.xlane.xlu0 %42 }
 0x13f   :  { %v69_v44 = vmul.f32 0.003125, %v43_v40 }
 0x140   :  { %v63_v41 = vadd.f32 %v37_v38, %v21_v10  ;;  %v70_v43 = vsub.f32 %v66_v39, %v68_v36 }
 0x142   :  { %v67_v45 = vsub.f32 %v63_v41, %v65_v42  ;;  %73 = vst.msk [vmem:[%s134_s2] sm:$0xff] %vm72_vm3, %v70_v43 }
 0x144   :  { %v71_v46 = vsub.f32 %v67_v45, %v69_v44 }
 0x146   :  { %74 = vst.msk [vmem:[%s134_s2 + $0x8] sm:$0xff] %vm72_vm3, %v71_v46 }

</bundles_post_ra>
